<compile_context>
chip_gen: v5e
topology: v5e:2x2
jax: 0.10.0
libtpu: 0.0.40
codegen_flags: <defaults>
</compile_context>

<pallas_src>
import functools

import jax
import jax.numpy as jnp
from jax.experimental import pallas as pl
from jax.experimental.pallas import tpu as pltpu


def _round_up(x, m):
    return ((x + m - 1) // m) * m


# ----------------------------- Pallas kernel ---------------------------------
def _disc_kernel(x_ref, w1_ref, w2_ref, out_ref):
    """One batch tile: Linear -> LeakyReLU(0.2) -> [Dropout=identity] -> Linear(->1) -> Sigmoid."""
    x = x_ref[...]                                                    # bf16 (TB, Kp)
    # Matmul 1 on the MXU: bf16 inputs, f32 accumulation.
    h = jnp.dot(x, w1_ref[...], preferred_element_type=jnp.float32)  # (TB, Hp) f32
    h = jnp.maximum(h, 0.2 * h)                                       # LeakyReLU(0.2), f32 VPU
    # TODO(synk): training-mode Dropout(0.3) (random mask + 1/0.7 scale) not implemented;
    #             eval-mode forward is identity.
    # Second Linear (hidden -> 1): single real output column, so use a VPU
    # multiply + lane reduce in f32 instead of a 128-wide MXU matmul.
    logits = jnp.sum(h * w2_ref[...], axis=-1, keepdims=True)         # (TB, 1) f32
    out_ref[...] = jax.nn.sigmoid(logits).astype(out_ref.dtype)


# --------------------------- parameter preparation ----------------------------
def prepare_params(params):
    """One-time weight prep (hoisted out of the per-call forward path):
    zero-pad W1 to lane-aligned (Kp, Hp) bf16, and W2 to a (1, Hp) f32 row."""
    in_dim, hidden = params["w1"].shape
    Kp = _round_up(in_dim, 128)
    Hp = _round_up(hidden, 128)
    w1_p = jnp.zeros((Kp, Hp), jnp.bfloat16).at[:in_dim, :hidden].set(
        params["w1"].astype(jnp.bfloat16))
    w2_p = jnp.zeros((1, Hp), jnp.float32).at[0, :hidden].set(
        params["w2"][:, 0].astype(jnp.float32))
    return {"label_emb": params["label_emb"], "w1_p": w1_p, "w2_p": w2_p}


# ------------------------------- wrapper --------------------------------------
def discriminator_moon_forward(img, labels, prepared, *, block_b=1024):
    """Embedding lookup + concat + minimal padding in JAX (same jit); hot path in Pallas."""
    B = img.shape[0]
    x = img.reshape(B, -1).astype(jnp.float32)                               # (B, dim)
    emb = jnp.take(prepared["label_emb"], labels.astype(jnp.int32), axis=0)  # (B, label_dim)
    d_in = jnp.concatenate([x, emb], axis=-1)                                # (B, in_dim)

    in_dim = d_in.shape[1]
    Kp, Hp = prepared["w1_p"].shape

    # Adaptive batch tiling: pad only to the bf16 sublane multiple (16) and let
    # the tile size shrink to the (padded) batch for small inputs.
    Bp0 = _round_up(max(B, 1), 16)
    TB = min(block_b, Bp0)
    Bp = _round_up(Bp0, TB)

    # Single pad op (no zeros + dynamic-update-slice round trip), bf16 for the MXU.
    x_p = jnp.pad(d_in.astype(jnp.bfloat16), ((0, Bp - B), (0, Kp - in_dim)))

    cost = pl.CostEstimate(
        flops=2 * Bp * Kp * Hp + 2 * Bp * Hp,            # matmul1 + VPU reduce
        transcendentals=Bp,                              # sigmoid per output row
        bytes_accessed=(x_p.size * 2                     # bf16 activations
                        + prepared["w1_p"].size * 2      # bf16 W1 (read once)
                        + prepared["w2_p"].size * 4      # f32 W2 row
                        + Bp * 4),                       # f32 (Bp, 1) output
    )

    out = pl.pallas_call(
        _disc_kernel,
        out_shape=jax.ShapeDtypeStruct((Bp, 1), jnp.float32),
        grid=(Bp // TB,),
        in_specs=[
            pl.BlockSpec((TB, Kp), lambda i: (i, 0)),    # batch-tiled input
            pl.BlockSpec((Kp, Hp), lambda i: (0, 0)),    # W1: VMEM-resident across steps
            pl.BlockSpec((1, Hp), lambda i: (0, 0)),     # W2 row: VMEM-resident
        ],
        out_specs=pl.BlockSpec((TB, 1), lambda i: (i, 0)),   # 1 real column only
        compiler_params=pltpu.CompilerParams(
            dimension_semantics=("parallel",),           # megacore sharding when grid > 1
            vmem_limit_bytes=32 * 1024 * 1024,           # safe on v5e/v6e/v7x
        ),
        cost_estimate=cost,
    )(x_p, prepared["w1_p"], prepared["w2_p"])

    return out[:B]                                       # (B, 1) validity


# --------------------------- parameter construction ---------------------------
def init_params(key, *, n_classes, label_dim, in_dim, hidden_dim):
    """PyTorch-like init: Linear U(-1/sqrt(fan_in), 1/sqrt(fan_in)) (no bias), Embedding N(0,1).
    Weights stored transposed (in_features, out_features) so the kernel computes h @ W."""
    k_emb, k_w1, k_w2 = jax.random.split(key, 3)
    params = {
        "label_emb": jax.random.normal(k_emb, (n_classes, label_dim), jnp.float32),
        "w1": jax.random.uniform(k_w1, (in_dim, hidden_dim), jnp.float32,
                                 -1.0 / in_dim ** 0.5, 1.0 / in_dim ** 0.5),
        "w2": jax.random.uniform(k_w2, (hidden_dim, 1), jnp.float32,
                                 -1.0 / hidden_dim ** 0.5, 1.0 / hidden_dim ** 0.5),
    }
    return params


def _reference_forward(img, labels, params):
    """Pure-JAX f32 reference (eval-mode)."""
    B = img.shape[0]
    x = img.reshape(B, -1).astype(jnp.float32)
    emb = jnp.take(params["label_emb"], labels.astype(jnp.int32), axis=0)
    d_in = jnp.concatenate([x, emb], axis=-1)
    h = d_in @ params["w1"]
    h = jnp.where(h > 0, h, 0.2 * h)
    return jax.nn.sigmoid(h @ params["w2"])


# ----------------------------------- main --------------------------------------
if __name__ == "__main__":
    # Moon-dataset-like small opt dims:
    #   dim=2 (2-D points), label_dim=8, n_classes=2, hidden_dim=32, batch=2
    batch = 2
    dim = 2
    label_dim = 8
    n_classes = 2
    hidden_dim = 32
    in_dim = dim + label_dim

    key = jax.random.PRNGKey(0)
    k_param, k_img, k_lab = jax.random.split(key, 3)

    params = init_params(k_param, n_classes=n_classes, label_dim=label_dim,
                         in_dim=in_dim, hidden_dim=hidden_dim)
    img = jax.random.normal(k_img, (batch, dim), jnp.float32)
    labels = jax.random.randint(k_lab, (batch,), 0, n_classes)

    prepared = prepare_params(params)            # one-time weight pad / cast (not per call)
    fwd = jax.jit(functools.partial(discriminator_moon_forward, prepared=prepared))
    validity = fwd(img, labels)
    jax.block_until_ready(validity)

    assert validity.shape == (batch, 1), validity.shape
    assert bool(jnp.all(jnp.isfinite(validity)))
    assert bool(jnp.all((validity >= 0.0) & (validity <= 1.0)))     # sigmoid range

    ref = _reference_forward(img, labels, params)
    assert bool(jnp.allclose(validity, ref, atol=1e-2, rtol=1e-2)), (validity, ref)

    print("KERNEL_OK")
</pallas_src>

<mosaic_0001>
module attributes {stable_mosaic.version = 11 : i64} {
  func.func @_disc_kernel(%arg0: i32, %arg1: memref<16x128xbf16, #tpu.memory_space<vmem>>, %arg2: memref<128x128xbf16, #tpu.memory_space<vmem>>, %arg3: memref<1x128xf32, #tpu.memory_space<vmem>>, %arg4: memref<16x1xf32, #tpu.memory_space<vmem>>) attributes {dimension_semantics = [#tpu.dimension_semantics<parallel>], iteration_bounds = array<i64: 1>, scalar_prefetch = 0 : i64, scratch_operands = 0 : i64, tpu.core_type = #tpu.core_type<tc>, window_params = [{transform_indices = @transform_0, window_bounds = array<i64: 16, 128>}, {pipeline_mode = #tpu.pipeline_mode<synchronous>, transform_indices = @transform_1, window_bounds = array<i64: 128, 128>}, {pipeline_mode = #tpu.pipeline_mode<synchronous>, transform_indices = @transform_2, window_bounds = array<i64: 1, 128>}, {transform_indices = @transform_3, window_bounds = array<i64: 16, 1>}]} {
    %c0 = arith.constant 0 : index
    %c0_0 = arith.constant 0 : index
    %0 = vector.load %arg1[%c0, %c0_0] : memref<16x128xbf16, #tpu.memory_space<vmem>>, vector<16x128xbf16>
    %c0_1 = arith.constant 0 : index
    %c0_2 = arith.constant 0 : index
    %1 = vector.load %arg2[%c0_1, %c0_2] : memref<128x128xbf16, #tpu.memory_space<vmem>>, vector<128x128xbf16>
    %cst = arith.constant dense<0.000000e+00> : vector<16x128xf32>
    %2 = tpu.matmul %0, %1, %cst {dimension_numbers = #tpu.dot_dimension_numbers<[1], [0], [0], [1], [0, 0, 1, 1], [], []>} : vector<16x128xbf16>, vector<128x128xbf16>, vector<16x128xf32> -> vector<16x128xf32>
    %cst_3 = arith.constant 2.000000e-01 : f32
    %3 = vector.broadcast %cst_3 : f32 to vector<16x128xf32>
    %4 = arith.mulf %3, %2 : vector<16x128xf32>
    %5 = arith.maximumf %2, %4 : vector<16x128xf32>
    %c0_4 = arith.constant 0 : index
    %c0_5 = arith.constant 0 : index
    %6 = vector.load %arg3[%c0_4, %c0_5] : memref<1x128xf32, #tpu.memory_space<vmem>>, vector<1x128xf32>
    %7 = vector.broadcast %6 : vector<1x128xf32> to vector<16x128xf32>
    %8 = arith.mulf %5, %7 : vector<16x128xf32>
    %cst_6 = arith.constant dense<0.000000e+00> : vector<16xf32>
    %9 = vector.multi_reduction <add>, %8, %cst_6 [1] : vector<16x128xf32> to vector<16xf32>
    %10 = vector.shape_cast %9 : vector<16xf32> to vector<16x1xf32>
    %11 = arith.negf %10 : vector<16x1xf32>
    %12 = math.exp %11 : vector<16x1xf32>
    %cst_7 = arith.constant 1.000000e+00 : f32
    %13 = vector.broadcast %cst_7 : f32 to vector<16x1xf32>
    %14 = arith.addf %13, %12 : vector<16x1xf32>
    %15 = arith.divf %13, %14 : vector<16x1xf32>
    %c0_8 = arith.constant 0 : index
    %c0_9 = arith.constant 0 : index
    %16 = vector.load %arg4[%c0_8, %c0_9] : memref<16x1xf32, #tpu.memory_space<vmem>>, vector<16x1xf32>
    tpu.vector_store %arg4[%c0_8, %c0_9], %15 {strides = array<i32>} : memref<16x1xf32, #tpu.memory_space<vmem>>, vector<16x1xf32>,
    return
  }
  func.func @transform_0(%arg0: i32) -> (i32, i32) {
    %c0_i32 = arith.constant 0 : i32
    %c0_i32_0 = arith.constant 0 : i32
    return %arg0, %c0_i32 : i32, i32
  }
  func.func @transform_1(%arg0: i32) -> (i32, i32) {
    %c0_i32 = arith.constant 0 : i32
    %c0_i32_0 = arith.constant 0 : i32
    %c0_i32_1 = arith.constant 0 : i32
    return %c0_i32, %c0_i32_0 : i32, i32
  }
  func.func @transform_2(%arg0: i32) -> (i32, i32) {
    %c0_i32 = arith.constant 0 : i32
    %c0_i32_0 = arith.constant 0 : i32
    %c0_i32_1 = arith.constant 0 : i32
    return %c0_i32, %c0_i32_0 : i32, i32
  }
  func.func @transform_3(%arg0: i32) -> (i32, i32) {
    %c0_i32 = arith.constant 0 : i32
    %c0_i32_0 = arith.constant 0 : i32
    return %arg0, %c0_i32 : i32, i32
  }
}

</mosaic_0001>

<bundles_post_ra>
// kernel: discriminator_moon_forward.1
= control target key start
LH: loop header
LB: loop body
LE: loop exit
PB: predicated region body
PF: predicated region fallthrough
CT: control target
= control target key end

     0   :  { %8 = vsyncpa [#allocation3], 0  ;;  %s261_s15 = smov [#allocation2]   ;;  %s262_s17 = smov 64   ;;  %s301_s0 = inlined_call_operand.vmem [shape: bf16[16,128], index: 0, kind: input, shape index: {}]   ;;  %s302_s1 = inlined_call_operand.hbm [shape: bf16[128,128], index: 1, kind: input, shape index: {}]   ;;  %s303_s2 = inlined_call_operand.vmem [shape: f32[1,128], index: 2, kind: input, shape index: {}]   ;;  %s304_s3 = inlined_call_operand.vmem [shape: f32[16,1], index: 3, kind: output, shape index: {}]  }
   0x1   :  { %s15_s14 = sshll.u32 %s302_s1, 4  ;;  %s17_s16 = sshll.u32 %s261_s15, 4  ;;  %s16_s14 = int_to_ptr.hbm [resolvable:$true] %s15_s14  ;;  %s18_s16 = int_to_ptr.vmem [resolvable:$true] %s17_s16 }
   0x2   :  { %s263_s18 = smov 4  }
   0x3   :  { %23 = dma.hbm_to_vmem [thread:$0]  %s16_s14, 1024, %s18_s16, [#allocation3], %s262_s17, %s262_s17, %s263_s18  }
   0x4   :  { %259 = dma.done.wait [#allocation3], 1024  }
   0x5   :  { %260 = vsyncadd [#allocation3], 4294966272  ;;  %v222_v0 = vld [vmem:[#allocation2 + $0x38] sm:$0xff]  ;;  %v221_v1 = vld [vmem:[#allocation2 + $0x30] sm:$0xff]  ;;  %vm168_vm2 = vcmask 7168  }
   0x6   :  { %102 = vmatpush.bf16.msra.mxu0 %v222_v0  ;;  %v220_v2 = vld [vmem:[#allocation2 + $0x28] sm:$0xff]  ;;  %v219_v3 = vld [vmem:[#allocation2 + $0x20] sm:$0xff]  ;;  %v218_v4 = vld [vmem:[#allocation2 + $0x18] sm:$0xff] }
   0x7   :  { %v217_v5 = vld [vmem:[#allocation2 + $0x10] sm:$0xff]  ;;  %v216_v6 = vld [vmem:[#allocation2 + $0x8] sm:$0xff]  ;;  %v215_v7 = vld [vmem:[#allocation2] sm:$0xff] }
   0x8   :  { %v214_v8 = vld [vmem:[%s301_s0] sm:$0xff] }
   0x9   :  { %v226_v11 = vld [vmem:[%s303_s2] ss:$0 sm:$0xff] }
   0xa   :  { %103 = vmatpush.bf16.msra.mxu0 %v221_v1 }
   0xe   :  { %104 = vmatpush.bf16.msra.mxu0 %v220_v2 }
  0x12   :  { %105 = vmatpush.bf16.msra.mxu0 %v219_v3 }
  0x16   :  { %106 = vmatpush.bf16.msra.mxu0 %v218_v4 }
  0x1a   :  { %107 = vmatpush.bf16.msra.mxu0 %v217_v5 }
  0x1e   :  { %108 = vmatpush.bf16.msra.mxu0 %v216_v6 }
  0x22   :  { %109 = vmatpush.bf16.msra.mxu0 %v215_v7 }
  0x25   :  { %110 = vmatmul.bf16.vlgmr.msra.gmra.mxu0 %v214_v8 }
  0xa2   :  { %v111_v9 = vpop.f32.mrf.mxu0 }
  0xa3   :  { %v116_v10 = vmul.f32 0.2, %v111_v9 }
  0xa5   :  { %v118_v12 = vmax.f32 %v111_v9, %v116_v10 }
  0xa7   :  { %v124_v13 = vmul.f32 %v226_v11, %v118_v12 }
  0xa9   :  { %126 = vadd.xlane.f32.xlu0 %v124_v13 }
  0xaa   :  { %v113_v14 = vpop.f32.mrf.mxu0 }
  0xab   :  { %v117_v15 = vmul.f32 0.2, %v113_v14 }
  0xad   :  { %v119_v16 = vmax.f32 %v113_v14, %v117_v15 }
  0xaf   :  { %v125_v17 = vmul.f32 %v226_v11, %v119_v16 }
  0xb1   :  { %128 = vadd.xlane.f32.xlu0 %v125_v17 }
 0x11c   :  { %v127_v18 = vpop.xlane.xlu0 %126 }
 0x11d   :  { %v212_v19 = vmul.f32 -1.442695, %v127_v18 }
 0x11f   :  { %227 = vpow2.f32 %v212_v19 }
 0x124   :  { %v129_v20 = vpop.xlane.xlu0 %128 }
 0x125   :  { %v228_v21 = vpop.eup %227  ;;  %v213_v22 = vmul.f32 -1.442695, %v129_v20 }
 0x126   :  { %v136_v23 = vadd.f32 1.0, %v228_v21 }
 0x127   :  { %229 = vpow2.f32 %v213_v22 }
 0x128   :  { %231 = vrcp.f32 %v136_v23  ;;  %v149_v29 = vand.u32 2147483648, %v136_v23  ;;  %v147_v31 = vand.u32 2147483647, %v136_v23  ;;  %vm143_vm1 = vweird.f32 %v136_v23 }
 0x12a   :  { %v150_v34 = vor.u32 1.1754944e-38, %v149_v29  ;;  %vm148_vm4 = vcmp.eq.f32.partialorder %v147_v31, 8.507059e+37 }
 0x12d   :  { %v230_v24 = vpop.eup %229 }
 0x12e   :  { %v232_v25 = vpop.eup %231  ;;  %v137_v26 = vadd.f32 1.0, %v230_v24 }
 0x12f   :  { %v139_v27 = vmul.f32 %v232_v25, %v136_v23  ;;  %vm144_vm0 = vweird.f32 %v232_v25 }
 0x130   :  { %233 = vrcp.f32 %v137_v26  ;;  %vm145_vm3 = vmor %vm143_vm1, %vm144_vm0  ;;  %v164_v39 = vand.u32 2147483648, %v137_v26  ;;  %v162_v41 = vand.u32 2147483647, %v137_v26  ;;  %vm158_vm6 = vweird.f32 %v137_v26 }
 0x131   :  { %v140_v28 = vsub.f32 1.0, %v139_v27 }
 0x132   :  { %v165_v43 = vor.u32 1.1754944e-38, %v164_v39  ;;  %vm163_vm8 = vcmp.eq.f32.partialorder %v162_v41, 8.507059e+37 }
 0x133   :  { %v141_v30 = vmul.f32 %v232_v25, %v140_v28 }
 0x135   :  { %v142_v32 = vadd.f32 %v232_v25, %v141_v30 }
 0x136   :  { %v234_v33 = vpop.eup %233 }
 0x137   :  { %v146_v35 = vsel %vm145_vm3, %v232_v25, %v142_v32  ;;  %v154_v36 = vmul.f32 %v234_v33, %v137_v26  ;;  %vm159_vm5 = vweird.f32 %v234_v33 }
 0x138   :  { %v151_v37 = vsel %vm148_vm4, %v150_v34, %v146_v35  ;;  %vm160_vm7 = vmor %vm158_vm6, %vm159_vm5 }
 0x139   :  { %169 = vst.msk [vmem:[%s304_s3] sm:$0xff] %vm168_vm2, %v151_v37  ;;  %v155_v38 = vsub.f32 1.0, %v154_v36 }
 0x13b   :  { %v156_v40 = vmul.f32 %v234_v33, %v155_v38 }
 0x13d   :  { %v157_v42 = vadd.f32 %v234_v33, %v156_v40 }
 0x13f   :  { %v161_v44 = vsel %vm160_vm7, %v234_v33, %v157_v42 }
 0x140   :  { %v166_v45 = vsel %vm163_vm8, %v165_v43, %v161_v44 }
 0x141   :  { %170 = vst.msk [vmem:[%s304_s3 + $0x8] sm:$0xff] %vm168_vm2, %v166_v45 }
 0x142   :  { %175 = vsyncpa [#allocation3], 1 }

</bundles_post_ra>
